<compile_context>
chip_gen: v7x
topology: tpu7x:2x2x1
jax: 0.10.0
libtpu: 0.0.40
codegen_flags: <defaults>
</compile_context>

<pallas_src>
import functools

import jax
import jax.numpy as jnp
from jax.experimental import pallas as pl
from jax.experimental.pallas import tpu as pltpu


# --------------------------------------------------------------------------------------
# helpers
# --------------------------------------------------------------------------------------
def _row_tile(nrows: int, target: int = 8192) -> int:
    """Row tile: full extent for small inputs (block == full dim is always legal),
    else a multiple-of-8 tile near `target` rows (~1 MiB per f32 stream at F=32)."""
    if nrows <= target:
        return nrows
    return target  # multiple of 8; ragged last block handled by Pallas boundary masking


def _apply_act(h, act):
    if act == "tanh":
        return jnp.tanh(h)
    if act == "relu":
        return jnp.maximum(h, 0.0)
    if act in (None, "none", "identity"):
        return h
    raise ValueError(f"unsupported activation: {act}")


class LinearSublayer:
    """Sublayer of the form act(y @ W + b) that the fused kernel understands."""

    def __init__(self, w, b=None, activation="tanh"):
        self.w = jnp.asarray(w)
        self.b = None if b is None else jnp.asarray(b)
        self.activation = activation

    def __call__(self, y):  # plain-JAX fallback / reference behaviour
        h = jnp.dot(y, self.w, precision=jax.lax.Precision.HIGHEST)
        if self.b is not None:
            h = h + self.b
        return _apply_act(h, self.activation)


# --------------------------------------------------------------------------------------
# kernels
# --------------------------------------------------------------------------------------
def _fused_kernel(x_ref, g_ref, b_ref, w_ref, wb_ref, *rest,
                  feat: int, eps: float, keep_prob: float, act, train: bool):
    """LayerNorm -> (TM,F)@(F,F) -> activation -> dropout -> residual add, one pass."""
    if train:
        u_ref, o_ref = rest
    else:
        (o_ref,) = rest

    x = x_ref[...].astype(jnp.float32)                               # (TM, F)
    mean = jnp.mean(x, axis=-1, keepdims=True)
    xc = x - mean
    var = jnp.sum(xc * xc, axis=-1, keepdims=True) * (1.0 / (feat - 1))   # torch .std(): unbiased
    inv = 1.0 / (jnp.sqrt(var) + eps)                                # one recip per row, reused
    y = g_ref[...].astype(jnp.float32) * (xc * inv) + b_ref[...].astype(jnp.float32)

    h = jnp.dot(y, w_ref[...].astype(jnp.float32),
                preferred_element_type=jnp.float32)                  # MXU, negligible at F=32
    h = h + wb_ref[...].astype(jnp.float32)
    h = _apply_act(h, act)

    if train:
        keep = u_ref[...] < keep_prob
        h = jnp.where(keep, h * (1.0 / keep_prob), 0.0)

    o_ref[...] = (x + h).astype(o_ref.dtype)


def _layernorm_kernel(x_ref, g_ref, b_ref, o_ref, *, feat: int, eps: float):
    x = x_ref[...].astype(jnp.float32)
    mean = jnp.mean(x, axis=-1, keepdims=True)
    xc = x - mean
    var = jnp.sum(xc * xc, axis=-1, keepdims=True) * (1.0 / (feat - 1))
    inv = 1.0 / (jnp.sqrt(var) + eps)
    o_ref[...] = (g_ref[...].astype(jnp.float32) * (xc * inv)
                  + b_ref[...].astype(jnp.float32)).astype(o_ref.dtype)


def _dropout_add_kernel(x_ref, s_ref, *rest, keep_prob: float, train: bool):
    if train:
        u_ref, o_ref = rest
    else:
        (o_ref,) = rest
    s = s_ref[...].astype(jnp.float32)
    if train:
        keep = u_ref[...] < keep_prob
        s = jnp.where(keep, s * (1.0 / keep_prob), 0.0)
    o_ref[...] = (x_ref[...].astype(jnp.float32) + s).astype(o_ref.dtype)


# --------------------------------------------------------------------------------------
# module
# --------------------------------------------------------------------------------------
class ResidualConnection:
    """JAX/Pallas port of the PyTorch ResidualConnection(size, dropout)."""

    def __init__(self, size: int = 32, dropout: float = 0.1, eps: float = 1e-6):
        self.size = int(size)
        self.p = float(dropout)
        self.eps = float(eps)
        # LayerNorm params, cast/reshaped once (hoisted out of the forward path).
        self.gamma2d = jnp.ones((1, self.size), jnp.float32)
        self.beta2d = jnp.zeros((1, self.size), jnp.float32)

    def set_params(self, gamma, beta):
        self.gamma2d = jnp.asarray(gamma, jnp.float32).reshape(1, self.size)
        self.beta2d = jnp.asarray(beta, jnp.float32).reshape(1, self.size)

    # ---- fused fast path: LN + linear sublayer + act + dropout + residual, one kernel ----
    def _fused(self, x2d, sub: LinearSublayer, training: bool, key):
        F = self.size
        R = x2d.shape[0]
        TM = _row_tile(R)
        grid = (pl.cdiv(R, TM),)

        w2d = jnp.asarray(sub.w, jnp.float32)
        wb2d = (jnp.zeros((1, F), jnp.float32) if sub.b is None
                else jnp.asarray(sub.b, jnp.float32).reshape(1, F))

        row_spec = pl.BlockSpec((TM, F), lambda i: (i, 0))
        res_spec = pl.BlockSpec((1, F), lambda i: (0, 0))    # gamma/beta/bias resident
        w_spec = pl.BlockSpec((F, F), lambda i: (0, 0))      # W resident

        in_specs = [row_spec, res_spec, res_spec, w_spec, res_spec]
        args = [x2d, self.gamma2d, self.beta2d, w2d, wb2d]
        train = bool(training) and self.p > 0.0
        if train:
            u = jax.random.uniform(key, (R, F), jnp.float32)
            in_specs.append(row_spec)
            args.append(u)

        kern = functools.partial(_fused_kernel, feat=F, eps=self.eps,
                                 keep_prob=1.0 - self.p, act=sub.activation, train=train)
        return pl.pallas_call(
            kern,
            out_shape=jax.ShapeDtypeStruct((R, F), x2d.dtype),
            grid=grid,
            in_specs=in_specs,
            out_specs=pl.BlockSpec((TM, F), lambda i: (i, 0)),
            compiler_params=pltpu.CompilerParams(dimension_semantics=("parallel",)),
        )(*args)

    # ---- general fallback: arbitrary python sublayer between two kernels ----
    def _general(self, x2d, sublayer, orig_shape, training: bool, key):
        F = self.size
        R = x2d.shape[0]
        TM = _row_tile(R)
        grid = (pl.cdiv(R, TM),)
        row_spec = pl.BlockSpec((TM, F), lambda i: (i, 0))
        res_spec = pl.BlockSpec((1, F), lambda i: (0, 0))

        y2d = pl.pallas_call(
            functools.partial(_layernorm_kernel, feat=F, eps=self.eps),
            out_shape=jax.ShapeDtypeStruct((R, F), x2d.dtype),
            grid=grid,
            in_specs=[row_spec, res_spec, res_spec],
            out_specs=pl.BlockSpec((TM, F), lambda i: (i, 0)),
            compiler_params=pltpu.CompilerParams(dimension_semantics=("parallel",)),
        )(x2d, self.gamma2d, self.beta2d)

        # Arbitrary sublayer runs as plain JAX on the logical shape.
        s = jnp.asarray(sublayer(y2d.reshape(orig_shape)))
        s2d = s.reshape(-1, F)
        assert s2d.shape == (R, F), "sublayer must preserve shape for the residual add"

        # Lane-dense view for the purely elementwise dropout+add kernel.
        if (R * F) % 128 == 0:
            Rf, Fv = (R * F) // 128, 128
            xv, sv = x2d.reshape(Rf, Fv), s2d.reshape(Rf, Fv)
        else:
            Rf, Fv, xv, sv = R, F, x2d, s2d
        TMf = _row_tile(Rf)
        blk = pl.BlockSpec((TMf, Fv), lambda i: (i, 0))

        in_specs = [blk, blk]
        args = [xv, sv]
        train = bool(training) and self.p > 0.0
        if train:
            u = jax.random.uniform(key, (Rf, Fv), jnp.float32)
            in_specs.append(blk)
            args.append(u)

        outv = pl.pallas_call(
            functools.partial(_dropout_add_kernel, keep_prob=1.0 - self.p, train=train),
            out_shape=jax.ShapeDtypeStruct((Rf, Fv), x2d.dtype),
            grid=(pl.cdiv(Rf, TMf),),
            in_specs=in_specs,
            out_specs=blk,
            compiler_params=pltpu.CompilerParams(dimension_semantics=("parallel",)),
        )(*args)
        return outv.reshape(R, F)

    # ---- forward ----
    def __call__(self, x, sublayer, *, training: bool = False, rng_key=None):
        F = self.size
        assert x.shape[-1] == F, "last dim must equal LayerNorm size"
        x2d = jnp.reshape(x, (-1, F))
        if training and rng_key is None:
            rng_key = jax.random.PRNGKey(0)
        if isinstance(sublayer, LinearSublayer) and sublayer.w.shape == (F, F):
            out2d = self._fused(x2d, sublayer, training, rng_key)
        else:
            out2d = self._general(x2d, sublayer, x.shape, training, rng_key)
        return out2d.reshape(x.shape)


# --------------------------------------------------------------------------------------
# demo / self-test
# --------------------------------------------------------------------------------------
if __name__ == "__main__":
    key = jax.random.PRNGKey(0)
    kx, kg, kb, kw = jax.random.split(key, 4)
    batch, seq, d = 2, 8, 32
    x = jax.random.normal(kx, (batch, seq, d), jnp.float32)

    rc = ResidualConnection(size=d, dropout=0.1)
    gamma = 1.0 + 0.1 * jax.random.normal(kg, (d,), jnp.float32)
    beta = 0.1 * jax.random.normal(kb, (d,), jnp.float32)
    rc.set_params(gamma, beta)

    w = jax.random.normal(kw, (d, d), jnp.float32) / jnp.sqrt(d)
    sub_fused = LinearSublayer(w, activation="tanh")

    # pure-JAX reference (unbiased std, eps added to std — matches the custom PyTorch module)
    mean = x.mean(-1, keepdims=True)
    var = ((x - mean) ** 2).sum(-1, keepdims=True) / (d - 1)
    y_ref = gamma * (x - mean) / (jnp.sqrt(var) + rc.eps) + beta
    s_ref = jnp.tanh(jnp.dot(y_ref, w, precision=jax.lax.Precision.HIGHEST))
    ref = x + s_ref

    # 1) eval mode, fused single-kernel path
    out_fused = rc(x, sub_fused, training=False)
    jax.block_until_ready(out_fused)
    assert out_fused.shape == x.shape
    err = float(jnp.max(jnp.abs(out_fused - ref)))
    assert jnp.allclose(out_fused, ref, atol=1e-4, rtol=1e-4), err

    # 2) eval mode, general fallback path (arbitrary callable sublayer)
    sub_lambda = lambda y: jnp.tanh(jnp.dot(y, w, precision=jax.lax.Precision.HIGHEST))
    out_gen = rc(x, sub_lambda, training=False)
    jax.block_until_ready(out_gen)
    err_gen = float(jnp.max(jnp.abs(out_gen - ref)))
    assert jnp.allclose(out_gen, ref, atol=1e-4, rtol=1e-4), err_gen

    # 3) training mode: every element must be x (dropped) or x + s/keep_prob (kept)
    keep = 1.0 - rc.p
    out_tr = rc(x, sub_fused, training=True, rng_key=jax.random.PRNGKey(1234))
    jax.block_until_ready(out_tr)
    assert out_tr.shape == x.shape
    assert bool(jnp.all(jnp.isfinite(out_tr)))
    ok = (jnp.isclose(out_tr, x, atol=1e-3)
          | jnp.isclose(out_tr, x + s_ref / keep, atol=1e-3))
    assert bool(jnp.all(ok))

    print("KERNEL_OK")
</pallas_src>

<mosaic_0001>
module attributes {stable_mosaic.version = 11 : i64} {
  func.func @_fused_kernel(%arg0: i32, %arg1: memref<16x32xf32, #tpu.memory_space<vmem>>, %arg2: memref<1x32xf32, #tpu.memory_space<vmem>>, %arg3: memref<1x32xf32, #tpu.memory_space<vmem>>, %arg4: memref<32x32xf32, #tpu.memory_space<vmem>>, %arg5: memref<1x32xf32, #tpu.memory_space<vmem>>, %arg6: memref<16x32xf32, #tpu.memory_space<vmem>>) attributes {dimension_semantics = [#tpu.dimension_semantics<parallel>], iteration_bounds = array<i64: 1>, scalar_prefetch = 0 : i64, scratch_operands = 0 : i64, tpu.core_type = #tpu.core_type<tc>, window_params = [{transform_indices = @transform_0, window_bounds = array<i64: 16, 32>}, {pipeline_mode = #tpu.pipeline_mode<synchronous>, transform_indices = @transform_1, window_bounds = array<i64: 1, 32>}, {pipeline_mode = #tpu.pipeline_mode<synchronous>, transform_indices = @transform_2, window_bounds = array<i64: 1, 32>}, {pipeline_mode = #tpu.pipeline_mode<synchronous>, transform_indices = @transform_3, window_bounds = array<i64: 32, 32>}, {pipeline_mode = #tpu.pipeline_mode<synchronous>, transform_indices = @transform_4, window_bounds = array<i64: 1, 32>}, {transform_indices = @transform_5, window_bounds = array<i64: 16, 32>}]} {
    %c0 = arith.constant 0 : index
    %c0_0 = arith.constant 0 : index
    %0 = vector.load %arg1[%c0, %c0_0] : memref<16x32xf32, #tpu.memory_space<vmem>>, vector<16x32xf32>
    %cst = arith.constant dense<0.000000e+00> : vector<16xf32>
    %1 = vector.multi_reduction <add>, %0, %cst [1] : vector<16x32xf32> to vector<16xf32>
    %2 = vector.shape_cast %1 : vector<16xf32> to vector<16x1xf32>
    %cst_1 = arith.constant 3.200000e+01 : f32
    %3 = vector.broadcast %cst_1 : f32 to vector<16x1xf32>
    %4 = arith.divf %2, %3 : vector<16x1xf32>
    %5 = vector.broadcast %4 : vector<16x1xf32> to vector<16x32xf32>
    %6 = arith.subf %0, %5 : vector<16x32xf32>
    %7 = arith.mulf %6, %6 : vector<16x32xf32>
    %cst_2 = arith.constant dense<0.000000e+00> : vector<16xf32>
    %8 = vector.multi_reduction <add>, %7, %cst_2 [1] : vector<16x32xf32> to vector<16xf32>
    %9 = vector.shape_cast %8 : vector<16xf32> to vector<16x1xf32>
    %cst_3 = arith.constant 0.0322580636 : f32
    %10 = vector.broadcast %cst_3 : f32 to vector<16x1xf32>
    %11 = arith.mulf %9, %10 : vector<16x1xf32>
    %12 = math.sqrt %11 : vector<16x1xf32>
    %cst_4 = arith.constant 9.99999997E-7 : f32
    %13 = vector.broadcast %cst_4 : f32 to vector<16x1xf32>
    %14 = arith.addf %12, %13 : vector<16x1xf32>
    %cst_5 = arith.constant 1.000000e+00 : f32
    %15 = vector.broadcast %cst_5 : f32 to vector<16x1xf32>
    %16 = arith.divf %15, %14 : vector<16x1xf32>
    %c0_6 = arith.constant 0 : index
    %c0_7 = arith.constant 0 : index
    %17 = vector.load %arg2[%c0_6, %c0_7] : memref<1x32xf32, #tpu.memory_space<vmem>>, vector<1x32xf32>
    %18 = vector.broadcast %16 : vector<16x1xf32> to vector<16x32xf32>
    %19 = arith.mulf %6, %18 : vector<16x32xf32>
    %20 = vector.broadcast %17 : vector<1x32xf32> to vector<16x32xf32>
    %21 = arith.mulf %20, %19 : vector<16x32xf32>
    %c0_8 = arith.constant 0 : index
    %c0_9 = arith.constant 0 : index
    %22 = vector.load %arg3[%c0_8, %c0_9] : memref<1x32xf32, #tpu.memory_space<vmem>>, vector<1x32xf32>
    %23 = vector.broadcast %22 : vector<1x32xf32> to vector<16x32xf32>
    %24 = arith.addf %21, %23 : vector<16x32xf32>
    %c0_10 = arith.constant 0 : index
    %c0_11 = arith.constant 0 : index
    %25 = vector.load %arg4[%c0_10, %c0_11] : memref<32x32xf32, #tpu.memory_space<vmem>>, vector<32x32xf32>
    %cst_12 = arith.constant dense<0.000000e+00> : vector<16x32xf32>
    %26 = tpu.matmul %24, %25, %cst_12 {dimension_numbers = #tpu.dot_dimension_numbers<[1], [0], [0], [1], [0, 0, 1, 1], [], []>} : vector<16x32xf32>, vector<32x32xf32>, vector<16x32xf32> -> vector<16x32xf32>
    %c0_13 = arith.constant 0 : index
    %c0_14 = arith.constant 0 : index
    %27 = vector.load %arg5[%c0_13, %c0_14] : memref<1x32xf32, #tpu.memory_space<vmem>>, vector<1x32xf32>
    %28 = vector.broadcast %27 : vector<1x32xf32> to vector<16x32xf32>
    %29 = arith.addf %26, %28 : vector<16x32xf32>
    %30 = math.tanh %29 : vector<16x32xf32>
    %31 = arith.addf %0, %30 : vector<16x32xf32>
    %c0_15 = arith.constant 0 : index
    %c0_16 = arith.constant 0 : index
    %32 = vector.load %arg6[%c0_15, %c0_16] : memref<16x32xf32, #tpu.memory_space<vmem>>, vector<16x32xf32>
    tpu.vector_store %arg6[%c0_15, %c0_16], %31 {strides = array<i32>} : memref<16x32xf32, #tpu.memory_space<vmem>>, vector<16x32xf32>,
    return
  }
  func.func @transform_0(%arg0: i32) -> (i32, i32) {
    %c0_i32 = arith.constant 0 : i32
    %c0_i32_0 = arith.constant 0 : i32
    return %arg0, %c0_i32 : i32, i32
  }
  func.func @transform_1(%arg0: i32) -> (i32, i32) {
    %c0_i32 = arith.constant 0 : i32
    %c0_i32_0 = arith.constant 0 : i32
    %c0_i32_1 = arith.constant 0 : i32
    return %c0_i32, %c0_i32_0 : i32, i32
  }
  func.func @transform_2(%arg0: i32) -> (i32, i32) {
    %c0_i32 = arith.constant 0 : i32
    %c0_i32_0 = arith.constant 0 : i32
    %c0_i32_1 = arith.constant 0 : i32
    return %c0_i32, %c0_i32_0 : i32, i32
  }
  func.func @transform_3(%arg0: i32) -> (i32, i32) {
    %c0_i32 = arith.constant 0 : i32
    %c0_i32_0 = arith.constant 0 : i32
    %c0_i32_1 = arith.constant 0 : i32
    return %c0_i32, %c0_i32_0 : i32, i32
  }
  func.func @transform_4(%arg0: i32) -> (i32, i32) {
    %c0_i32 = arith.constant 0 : i32
    %c0_i32_0 = arith.constant 0 : i32
    %c0_i32_1 = arith.constant 0 : i32
    return %c0_i32, %c0_i32_0 : i32, i32
  }
  func.func @transform_5(%arg0: i32) -> (i32, i32) {
    %c0_i32 = arith.constant 0 : i32
    %c0_i32_0 = arith.constant 0 : i32
    return %arg0, %c0_i32 : i32, i32
  }
}

</mosaic_0001>

<bundles_post_ra>
// kernel: tpu_custom_call.1
= control target key start
LH: loop header
LB: loop body
LE: loop exit
PB: predicated region body
PF: predicated region fallthrough
CT: control target
= control target key end

     0   :  { %10 = vsyncpa [#allocation3], 0  ;;  %s455_s0 = inlined_call_operand.hbm [shape: f32[16,32], index: 0, kind: input, shape index: {}]   ;;  %s456_s1 = inlined_call_operand.vmem [shape: f32[1,32], index: 1, kind: input, shape index: {}]   ;;  %s457_s2 = inlined_call_operand.vmem [shape: f32[1,32], index: 2, kind: input, shape index: {}]   ;;  %s458_s3 = inlined_call_operand.hbm [shape: f32[32,32], index: 3, kind: input, shape index: {}]   ;;  %s459_s4 = inlined_call_operand.vmem [shape: f32[1,32], index: 4, kind: input, shape index: {}]   ;;  %s460_s5 = inlined_call_operand.hbm [shape: f32[16,32], index: 5, kind: output, shape index: {}]  }
   0x1   :  { %11 = vsyncpa [#allocation6], 0 }
   0x2   :  { %12 = vsyncpa [#allocation4], 0  ;;  %s348_s18 = smov [#allocation2]   ;;  %s276_s22 = scalar_lea.hbm %s455_s0, 256 }
   0x3   :  { %s18_s19 = sshll.u32 %s348_s18, 4  ;;  %p277_p0 = scmp.ne.s32.totalorder %s455_s0, %s276_s22  ;;  %s19_s19 = int_to_ptr.vmem [resolvable:$true] %s18_s19 }
   0x4   :  { %p280_p1 = scmp.lt.u32.totalorder %s276_s22, %s455_s0 }
   0x6   :  { %p282_p2 = pnand %p280_p1, %p277_p0 }
   0x8   :  { %285 = shalt.err (!%p282_p2)
}
   0x9   :  { %s286_s27 = scalar_lea.vmem %s19_s19, 256  ;;  %p291_p4 = scmp.lt.s32.totalorder %s19_s19, %s19_s19 }
   0xa   :  { %p287_p3 = scmp.ne.s32.totalorder %s19_s19, %s286_s27  ;;  %p292_p5 = scmp.lt.s32.totalorder %s286_s27, %s286_s27 }
   0xc   :  { %p293_p6 = por %p292_p5, %p291_p4 }
   0xe   :  { %p294_p7 = pnand %p293_p6, %p287_p3 }
  0x10   :  { %297 = shalt.err (!%p294_p7)
}
  0x11   :  { %s349_s28 = smov 128   ;;  %s350_s29 = smov 8  }
  0x12   :  { %24 = dma.hbm_to_vmem [thread:$0]  %s455_s0, 256, %s19_s19, [#allocation3], %s349_s28, %s349_s28, %s350_s29  }
  0x13   :  { %s351_s7 = smov [#allocation5]   ;;  %s298_s11 = scalar_lea.hbm %s458_s3, 512 }
  0x14   :  { %s34_s8 = sshll.u32 %s351_s7, 4  ;;  %p299_p8 = scmp.ne.s32.totalorder %s458_s3, %s298_s11  ;;  %s35_s8 = int_to_ptr.vmem [resolvable:$true] %s34_s8 }
  0x15   :  { %p302_p9 = scmp.lt.u32.totalorder %s298_s11, %s458_s3 }
  0x17   :  { %p304_p10 = pnand %p302_p9, %p299_p8 }
  0x19   :  { %307 = shalt.err (!%p304_p10)
}
  0x1a   :  { %s308_s16 = scalar_lea.vmem %s35_s8, 512  ;;  %p313_p12 = scmp.lt.s32.totalorder %s35_s8, %s35_s8 }
  0x1b   :  { %p309_p11 = scmp.ne.s32.totalorder %s35_s8, %s308_s16  ;;  %p314_p13 = scmp.lt.s32.totalorder %s308_s16, %s308_s16 }
  0x1d   :  { %p315_p0 = por %p314_p13, %p313_p12 }
  0x1f   :  { %p316_p1 = pnand %p315_p0, %p309_p11 }
  0x21   :  { %319 = shalt.err (!%p316_p1)
}
  0x22   :  { %40 = dma.hbm_to_vmem [thread:$0]  %s458_s3, 512, %s35_s8, [#allocation6], %s349_s28, %s349_s28, %s350_s29  }
  0x23   :  { %342 = dma.done.wait [#allocation3], 256  }
  0x24   :  { %343 = vsyncadd [#allocation3], 4294967040 }
  0x25   :  { %344 = dma.done.wait [#allocation6], 512  }
  0x26   :  { %345 = vsyncadd [#allocation6], 4294966784  ;;  %vm51_vm0 = vcmask 261120   ;;  %v413_v0 = vld [vmem:[#allocation2] sm:$0xff]  ;;  %v415_v1 = vld [vmem:[#allocation2 + $0x8] sm:$0xff] }
  0x27   :  { %v52_v2 = vsel %vm51_vm0, %v413_v0, 0.0  ;;  %v55_v3 = vsel %vm51_vm0, %v415_v1, 0.0  ;;  %v113_v14 = vld [vmem:[#allocation5] sm:$0xff]  ;;  %v114_v15 = vld [vmem:[#allocation5 + $0x8] sm:$0xff]  ;;  %v115_v16 = vld [vmem:[#allocation5 + $0x10] sm:$0xff] }
  0x28   :  { %53 = vadd.xlane.f32.xlu0 %v52_v2  ;;  %v251_v17 = vpack.c.bf16 %v114_v15, %v113_v14  ;;  %v116_v18 = vld [vmem:[#allocation5 + $0x18] sm:$0xff]  ;;  %v229_v37 = vld [vmem:[%s456_s1] ss:$0 sm:$0xff]  ;;  %s352_s1 = smov [#allocation7]  }
  0x29   :  { %v255_v19 = vpack.c.bf16 %v116_v18, %v115_v16  ;;  %v230_v39 = vld [vmem:[%s457_s2] ss:$0 sm:$0xff]  ;;  %s216_s2 = sshll.u32 %s352_s1, 4  ;;  %s217_s2 = int_to_ptr.vmem [resolvable:$true] %s216_s2 }
  0x2a   :  { %252 = vmatprep.subr.bf16.mxu0 %v251_v17  ;;  %v231_v46 = vld [vmem:[%s459_s4] ss:$0 sm:$0xff]  ;;  %s320_s4 = scalar_lea.vmem %s217_s2, 256  ;;  %p325_p3 = scmp.lt.s32.totalorder %s217_s2, %s217_s2 }
  0x2b   :  { %254 = vmatpush3.bf16.msra.mxu0 %v251_v17  ;;  %p321_p2 = scmp.ne.s32.totalorder %s217_s2, %s320_s4  ;;  %p326_p4 = scmp.lt.s32.totalorder %s320_s4, %s320_s4 }
  0x2c   :  { %56 = vadd.xlane.f32.xlu0 %v55_v3  ;;  %256 = vmatprep.subr.bf16.mxu0 %v255_v19 }
  0x2d   :  { %p327_p5 = por %p326_p4, %p325_p3 }
  0x2f   :  { %258 = vmatpush3.bf16.msra.mxu0 %v255_v19  ;;  %p328_p6 = pnand %p327_p5, %p321_p2 }
  0xb5   :  { %v54_v4 = vpop.xlane.xlu0 %53 }
  0xb6   :  { %v59_v5 = vmul.f32 0.03125, %v54_v4 }
  0xb8   :  { %v61_v6 = vsub.f32 %v413_v0, %v59_v5 }
  0xb9   :  { %v57_v7 = vpop.xlane.xlu0 %56 }
  0xba   :  { %v60_v8 = vmul.f32 0.03125, %v57_v7  ;;  %v63_v9 = vmul.f32 %v61_v6, %v61_v6 }
  0xbc   :  { %v62_v10 = vsub.f32 %v415_v1, %v60_v8  ;;  %v65_v11 = vsel %vm51_vm0, %v63_v9, 0.0 }
  0xbd   :  { %66 = vadd.xlane.f32.xlu1 %v65_v11 }
  0xbe   :  { %v64_v12 = vmul.f32 %v62_v10, %v62_v10 }
  0xc0   :  { %v68_v13 = vsel %vm51_vm0, %v64_v12, 0.0 }
  0xc1   :  { %69 = vadd.xlane.f32.xlu1 %v68_v13 }
 0x14a   :  { %v67_v20 = vpop.xlane.xlu1 %66 }
 0x14b   :  { %v71_v21 = vmul.f32 0.032258064, %v67_v20 }
 0x14d   :  { %264 = vrsqrt.f32 %v71_v21  ;;  %vm75_vm1 = vcmp.eq.f32.partialorder %v71_v21, inf  ;;  %v78_v26 = vand.u32 2147483648, %v71_v21  ;;  %vm77_vm2 = vcmp.eq.f32.partialorder %v71_v21, 0.0 }
 0x14e   :  { %v70_v22 = vpop.xlane.xlu1 %69 }
 0x14f   :  { %v72_v23 = vmul.f32 0.032258064, %v70_v22 }
 0x151   :  { %266 = vrsqrt.f32 %v72_v23  ;;  %vm82_vm3 = vcmp.eq.f32.partialorder %v72_v23, inf  ;;  %v85_v32 = vand.u32 2147483648, %v72_v23  ;;  %vm84_vm4 = vcmp.eq.f32.partialorder %v72_v23, 0.0 }
 0x157   :  { %v265_v24 = vpop.eup %264 }
 0x158   :  { %v74_v25 = vmul.f32 %v265_v24, %v71_v21 }
 0x15a   :  { %v76_v27 = vsel %vm75_vm1, %v71_v21, %v74_v25 }
 0x15b   :  { %v267_v28 = vpop.eup %266  ;;  %v79_v29 = vsel %vm77_vm2, %v78_v26, %v76_v27 }
 0x15c   :  { %v81_v30 = vmul.f32 %v267_v28, %v72_v23  ;;  %v87_v31 = vadd.f32 1e-06, %v79_v29 }
 0x15e   :  { %v83_v33 = vsel %vm82_vm3, %v72_v23, %v81_v30  ;;  %268 = vrcp.f32 %v87_v31 }
 0x15f   :  { %v86_v34 = vsel %vm84_vm4, %v85_v32, %v83_v33 }
 0x160   :  { %v88_v35 = vadd.f32 1e-06, %v86_v34 }
 0x162   :  { %270 = vrcp.f32 %v88_v35 }
 0x168   :  { %v269_v36 = vpop.eup %268 }
 0x169   :  { %v94_v38 = vmul.f32 %v269_v36, %v61_v6 }
 0x16b   :  { %v102_v40 = vmul.f32 %v229_v37, %v94_v38 }
 0x16c   :  { %v271_v41 = vpop.eup %270 }
 0x16d   :  { %v95_v42 = vmul.f32 %v271_v41, %v62_v10  ;;  %v111_v43 = vadd.f32 %v230_v39, %v102_v40 }
 0x16f   :  { %v103_v44 = vmul.f32 %v229_v37, %v95_v42  ;;  %248 = vmatprep.mubr.msk.f32.mxu0 %vm51_vm0, %v111_v43 }
 0x171   :  { %v112_v45 = vadd.f32 %v230_v39, %v103_v44 }
 0x173   :  { %249 = vmatmul.mubr.msk.f32.vlgmr.msra.gmra.mrb[0].mxu0 %vm51_vm0, %v112_v45 }
 0x246   :  { %v250_v47 = vpop.f32.mrb[0].mxu0 }
 0x247   :  { %v202_v48 = vadd.f32 %v250_v47, %v231_v46  ;;  %v196_v49 = vpop.f32.mrb[1].mxu0 }
 0x248   :  { %v197_v50 = vadd.f32 %v231_v46, %v196_v49 }
 0x249   :  { %272 = vtanh.f32 %v202_v48 }
 0x24a   :  { %274 = vtanh.f32 %v197_v50 }
 0x253   :  { %v273_v51 = vpop.eup %272 }
 0x254   :  { %v275_v52 = vpop.eup %274  ;;  %v208_v53 = vadd.f32 %v273_v51, %v415_v1 }
 0x255   :  { %v207_v54 = vadd.f32 %v275_v52, %v413_v0 }
 0x256   :  { %210 = vst.msk [vmem:[#allocation7 + $0x8] sm:$0xff] %vm51_vm0, %v208_v53 }
 0x257   :  { %209 = vst.msk [vmem:[#allocation7] sm:$0xff] %vm51_vm0, %v207_v54 }
 0x258   :  { %331 = shalt.err (!%p328_p6)
}
 0x259   :  { %s332_s25 = scalar_lea.hbm %s460_s5, 256 }
 0x25a   :  { %p333_p7 = scmp.ne.s32.totalorder %s460_s5, %s332_s25  ;;  %p336_p8 = scmp.lt.u32.totalorder %s332_s25, %s460_s5 }
 0x25c   :  { %p338_p9 = pnand %p336_p8, %p333_p7 }
 0x25e   :  { %341 = shalt.err (!%p338_p9)
}
 0x25f   :  { %222 = dma.vmem_to_hbm [thread:$0]  %s217_s2, 256, %s460_s5, [#allocation4], %s349_s28, %s349_s28, %s350_s29  }
 0x260   :  { %346 = dma.done.wait [#allocation4], 256  }
 0x261   :  { %347 = vsyncadd [#allocation4], 4294967040 }
 0x262   :  { %226 = vsyncpa [#allocation3], 1 }
 0x263   :  { %227 = vsyncpa [#allocation6], 1 }
 0x264   :  { %228 = vsyncpa [#allocation4], 1 }

</bundles_post_ra>
